<compile_context>
chip_gen: v7x
topology: tpu7x:2x2x1
jax: 0.10.0
libtpu: 0.0.40
codegen_flags: <defaults>
</compile_context>

<pallas_src>
from functools import partial

import jax
import jax.numpy as jnp
import numpy as np
from jax.experimental import pallas as pl
from jax.experimental.pallas import tpu as pltpu

_ONE_HOT_MAX_CARD = 1024          # one-hot MXU gather only for small tables
_RESIDENT_BUDGET_BYTES = 6 << 20  # per-copy VMEM budget for resident tables
                                  # (pipeline double-buffers -> ~12 MiB worst case)
_DMA_WINDOW = 32                  # max in-flight row DMAs per HBM table


def _round_up(x, m):
    return (x + m - 1) // m * m


def _make_kernel(num_tables, resident, cards, emb_sizes, col_offsets,
                 tile_b, table_dtype, num_hbm):
    """Builds the fused multi-table gather + concat kernel body."""

    def kernel(*args):
        pos = 0
        idx_smem = None
        if num_hbm > 0:
            idx_smem = args[pos]              # SMEM int32 [T, B_pad] (prefetched)
            pos += 1
        idx_vmem = args[pos]                  # VMEM int32 [tile_b, T]
        pos += 1
        tables = args[pos:pos + num_tables]   # resident: VMEM blocks; else HBM refs
        pos += num_tables
        out_ref = args[pos]                   # VMEM [tile_b, sum_E]
        pos += 1
        scratch = args[pos:]
        bufs = scratch[:num_hbm]              # VMEM [tile_b, E_t] staging buffers
        sems = scratch[num_hbm] if num_hbm > 0 else None

        b_base = pl.program_id(0) * tile_b

        # ---- VMEM-resident tables: vectorized one-hot gather on the MXU ----
        for t in range(num_tables):
            if not resident[t]:
                continue
            c0, c1 = col_offsets[t], col_offsets[t + 1]
            idx_col = idx_vmem[:, t:t + 1]                          # (tile_b, 1)
            onehot = (idx_col == jax.lax.broadcasted_iota(
                jnp.int32, (tile_b, cards[t]), 1)).astype(table_dtype)
            rows = jnp.dot(onehot, tables[t][...],
                           preferred_element_type=jnp.float32)
            out_ref[:, c0:c1] = rows.astype(table_dtype)

        # ---- HBM tables: per-row gather DMAs with a bounded in-flight window ----
        slot = 0
        for t in range(num_tables):
            if resident[t]:
                continue
            c0, c1 = col_offsets[t], col_offsets[t + 1]
            tbl = tables[t]
            buf = bufs[slot]
            sem = sems.at[slot]

            def row_copy(r, tbl=tbl, buf=buf, sem=sem, t=t):
                row = idx_smem[t, b_base + r]        # pre-clamped in the wrapper
                return pltpu.make_async_copy(
                    tbl.at[pl.ds(row, 1), :], buf.at[pl.ds(r, 1), :], sem)

            def issue(r, carry, row_copy=row_copy):
                row_copy(r).start()

                @pl.when(r >= _DMA_WINDOW)
                def _():
                    row_copy(r - _DMA_WINDOW).wait()

                return carry

            jax.lax.fori_loop(0, tile_b, issue, 0, unroll=8)

            def drain(r, carry, row_copy=row_copy):
                row_copy(r).wait()
                return carry

            jax.lax.fori_loop(max(tile_b - _DMA_WINDOW, 0), tile_b, drain, 0,
                              unroll=8)

            # One vectorized copy of the gathered rows into the output block.
            # TODO(synk): DMA rows straight into out_ref[:, c0:c1] (dropping the
            # staging buffer) once non-lane-aligned DMA destinations are verified
            # on all target generations.
            out_ref[:, c0:c1] = buf[...]
            slot += 1

    return kernel


@partial(jax.jit,
         static_argnames=("one_hot_max_card", "resident_budget_bytes"))
def _concatenated_embeddings_forward(
        x, tables,
        one_hot_max_card=_ONE_HOT_MAX_CARD,
        resident_budget_bytes=_RESIDENT_BUDGET_BYTES):
    """x: [B, T] integer indices; tables: tuple of [C_t, E_t] float arrays."""
    if x.ndim <= 1:
        x = x[None, :]
    B, T = x.shape
    assert T == len(tables), "num_variables must match number of tables"

    table_dtype = tables[0].dtype
    assert all(t.dtype == table_dtype for t in tables), \
        "all embedding tables must share a dtype (cast up front otherwise)"
    itemsize = np.dtype(table_dtype).itemsize

    cards = tuple(int(t.shape[0]) for t in tables)
    emb_sizes = tuple(int(t.shape[1]) for t in tables)
    col_offsets = [0] + [int(v) for v in np.cumsum(emb_sizes)]
    sum_e = col_offsets[-1]

    # ---- classify tables: VMEM-resident one-hot path vs HBM row-gather ----
    resident = []
    resident_bytes = 0
    for c, e in zip(cards, emb_sizes):
        padded = _round_up(c, 8) * _round_up(e, 128) * itemsize
        keep = (c <= one_hot_max_card
                and resident_bytes + padded <= resident_budget_bytes)
        if keep:
            resident_bytes += padded
        resident.append(keep)
    resident = tuple(resident)
    num_hbm = sum(1 for r in resident if not r)

    # ---- batch tiling: large tiles amortize per-grid-step overhead ----
    tile_b = _round_up(B, 8) if B <= 512 else 512   # 512 is a multiple of 128
    b_pad = _round_up(B, tile_b)
    grid = (b_pad // tile_b,)

    # ---- index prep (hoisted out of the kernel): int32 + vectorized clamp ----
    max_idx = jnp.asarray([c - 1 for c in cards], dtype=jnp.int32)[None, :]
    idx = jnp.clip(x.astype(jnp.int32), 0, max_idx)
    if b_pad != B:
        idx = jnp.pad(idx, ((0, b_pad - B), (0, 0)))   # padded rows gather row 0

    kernel = _make_kernel(T, resident, cards, emb_sizes, col_offsets, tile_b,
                          table_dtype, num_hbm)

    in_specs = [pl.BlockSpec((tile_b, T), lambda i, *_: (i, 0))]   # idx (VMEM)
    for t in range(T):
        if resident[t]:
            # Whole-table block + constant index_map -> fetched once, stays
            # resident in VMEM across the whole grid.
            in_specs.append(pl.BlockSpec((cards[t], emb_sizes[t]),
                                         lambda i, *_: (0, 0)))
        else:
            in_specs.append(pl.BlockSpec(memory_space=pl.ANY))

    scratch_shapes = [pltpu.VMEM((tile_b, emb_sizes[t]), table_dtype)
                      for t in range(T) if not resident[t]]
    if num_hbm:
        scratch_shapes.append(pltpu.SemaphoreType.DMA((num_hbm,)))

    # ---- explicit VMEM budget (safe on v5e / v6e / v7x scoped-VMEM defaults) ----
    out_block_bytes = tile_b * _round_up(sum_e, 128) * itemsize
    idx_block_bytes = tile_b * 128 * 4
    max_res_c = max([c for c, r in zip(cards, resident) if r], default=0)
    onehot_tmp_bytes = tile_b * _round_up(max_res_c, 128) * 4
    hbm_buf_bytes = sum(tile_b * _round_up(emb_sizes[t], 128) * itemsize
                        for t in range(T) if not resident[t])
    vmem_limit = (2 * resident_bytes + 2 * out_block_bytes + 2 * idx_block_bytes
                  + 2 * onehot_tmp_bytes + hbm_buf_bytes + (4 << 20))
    vmem_limit = int(min(max(vmem_limit, 16 << 20), 32 << 20))

    call = pl.pallas_call(
        kernel,
        out_shape=jax.ShapeDtypeStruct((b_pad, sum_e), table_dtype),
        grid_spec=pltpu.PrefetchScalarGridSpec(
            num_scalar_prefetch=1 if num_hbm else 0,
            grid=grid,
            in_specs=in_specs,
            out_specs=pl.BlockSpec((tile_b, sum_e), lambda i, *_: (i, 0)),
            scratch_shapes=tuple(scratch_shapes)),
        compiler_params=pltpu.CompilerParams(
            dimension_semantics=("parallel",),   # shard batch tiles on v7x 2 TCs
            vmem_limit_bytes=vmem_limit),
    )

    if num_hbm:
        # Scalar-prefetched [T, B_pad] copy for DMA addressing (long axis last
        # keeps the SMEM footprint at 8 * ceil(B_pad/128)*128 words).
        # TODO(synk): switch to per-tile SMEM index blocks for very large B*T.
        out = call(idx.T, idx, *tables)
    else:
        out = call(idx, *tables)

    return out[:B] if b_pad != B else out


class ConcatenatedEmbeddings:
    """JAX/Pallas port of the PyTorch ConcatenatedEmbeddings module."""

    def __init__(self, embedding_table_shapes, dropout=0.0, key=None):
        if key is None:
            key = jax.random.PRNGKey(0)
        self.dropout = dropout  # p=0.0 (module default / eval) -> identity
        tables = []
        for i, (_col, (cat_size, emb_size)) in enumerate(
                embedding_table_shapes.items()):
            k = jax.random.fold_in(key, i)
            # torch.nn.Embedding default init: N(0, 1)
            tables.append(jax.random.normal(k, (cat_size, emb_size),
                                            dtype=jnp.float32))
        self.tables = tuple(tables)

    def __call__(self, x):
        out = _concatenated_embeddings_forward(x, self.tables)
        # dropout p=0.0 -> identity
        # TODO(synk): training-mode dropout for p > 0 (pltpu.prng_*) omitted.
        return out


if __name__ == "__main__":
    key = jax.random.PRNGKey(0)

    embedding_table_shapes = {
        "cat_a": (10, 8),
        "cat_b": (20, 16),
        "cat_c": (7, 4),
    }
    batch = 8

    module = ConcatenatedEmbeddings(embedding_table_shapes, dropout=0.0,
                                    key=jax.random.fold_in(key, 123))

    # Deterministic integer category indices, one column per table.
    idx_key = jax.random.fold_in(key, 7)
    cols = []
    for i, (_, (cat_size, _)) in enumerate(embedding_table_shapes.items()):
        cols.append(jax.random.randint(jax.random.fold_in(idx_key, i),
                                       (batch,), 0, cat_size, dtype=jnp.int32))
    x = jnp.stack(cols, axis=1)  # [batch, num_variables]

    # Reference: plain-JAX gather + concat.
    ref = jnp.concatenate(
        [jnp.take(t, x[:, i], axis=0) for i, t in enumerate(module.tables)],
        axis=1)

    # 1) Default path: all tables are small -> VMEM-resident one-hot MXU gather.
    out = jax.block_until_ready(module(x))
    assert out.shape == (batch,
                         sum(e for _, e in embedding_table_shapes.values()))
    assert out.dtype == jnp.float32
    assert jnp.allclose(out, ref, atol=1e-6), "VMEM path mismatch vs reference"

    # 2) Force the HBM row-gather DMA path (used for large tables in production)
    #    and check it against the same reference.
    out_hbm = jax.block_until_ready(
        _concatenated_embeddings_forward(x, module.tables, one_hot_max_card=0))
    assert jnp.allclose(out_hbm, ref, atol=1e-6), "HBM path mismatch vs reference"

    print("KERNEL_OK")
</pallas_src>

<mosaic_0001>
module attributes {stable_mosaic.version = 11 : i64} {
  func.func @kernel(%arg0: i32, %arg1: memref<8x3xi32, #tpu.memory_space<vmem>>, %arg2: memref<10x8xf32, #tpu.memory_space<vmem>>, %arg3: memref<20x16xf32, #tpu.memory_space<vmem>>, %arg4: memref<7x4xf32, #tpu.memory_space<vmem>>, %arg5: memref<8x28xf32, #tpu.memory_space<vmem>>) attributes {dimension_semantics = [#tpu.dimension_semantics<parallel>], iteration_bounds = array<i64: 1>, scalar_prefetch = 0 : i64, scratch_operands = 0 : i64, tpu.core_type = #tpu.core_type<tc>, window_params = [{transform_indices = @transform_0, window_bounds = array<i64: 8, 3>}, {pipeline_mode = #tpu.pipeline_mode<synchronous>, transform_indices = @transform_1, window_bounds = array<i64: 10, 8>}, {pipeline_mode = #tpu.pipeline_mode<synchronous>, transform_indices = @transform_2, window_bounds = array<i64: 20, 16>}, {pipeline_mode = #tpu.pipeline_mode<synchronous>, transform_indices = @transform_3, window_bounds = array<i64: 7, 4>}, {transform_indices = @transform_4, window_bounds = array<i64: 8, 28>}]} {
    %c0 = arith.constant 0 : index
    %c0_0 = arith.constant 0 : index
    %0 = vector.load %arg1[%c0, %c0_0] : memref<8x3xi32, #tpu.memory_space<vmem>>, vector<8x1xi32>
    %1 = tpu.iota {dimensions = array<i32: 1>} : vector<8x10xi32>
    %2 = vector.broadcast %0 : vector<8x1xi32> to vector<8x10xi32>
    %3 = arith.cmpi eq, %2, %1 : vector<8x10xi32>
    %4 = arith.extui %3 : vector<8x10xi1> to vector<8x10xi32>
    %5 = arith.sitofp %4 : vector<8x10xi32> to vector<8x10xf32>
    %c0_1 = arith.constant 0 : index
    %c0_2 = arith.constant 0 : index
    %6 = vector.load %arg2[%c0_1, %c0_2] : memref<10x8xf32, #tpu.memory_space<vmem>>, vector<10x8xf32>
    %cst = arith.constant dense<0.000000e+00> : vector<8x8xf32>
    %7 = tpu.matmul %5, %6, %cst {dimension_numbers = #tpu.dot_dimension_numbers<[1], [0], [0], [1], [0, 0, 1, 1], [], []>} : vector<8x10xf32>, vector<10x8xf32>, vector<8x8xf32> -> vector<8x8xf32>
    %c0_3 = arith.constant 0 : index
    %c0_4 = arith.constant 0 : index
    %8 = vector.load %arg5[%c0_3, %c0_4] : memref<8x28xf32, #tpu.memory_space<vmem>>, vector<8x8xf32>
    tpu.vector_store %arg5[%c0_3, %c0_4], %7 {strides = array<i32>} : memref<8x28xf32, #tpu.memory_space<vmem>>, vector<8x8xf32>,
    %c0_5 = arith.constant 0 : index
    %c1 = arith.constant 1 : index
    %9 = vector.load %arg1[%c0_5, %c1] : memref<8x3xi32, #tpu.memory_space<vmem>>, vector<8x1xi32>
    %10 = tpu.iota {dimensions = array<i32: 1>} : vector<8x20xi32>
    %11 = vector.broadcast %9 : vector<8x1xi32> to vector<8x20xi32>
    %12 = arith.cmpi eq, %11, %10 : vector<8x20xi32>
    %13 = arith.extui %12 : vector<8x20xi1> to vector<8x20xi32>
    %14 = arith.sitofp %13 : vector<8x20xi32> to vector<8x20xf32>
    %c0_6 = arith.constant 0 : index
    %c0_7 = arith.constant 0 : index
    %15 = vector.load %arg3[%c0_6, %c0_7] : memref<20x16xf32, #tpu.memory_space<vmem>>, vector<20x16xf32>
    %cst_8 = arith.constant dense<0.000000e+00> : vector<8x16xf32>
    %16 = tpu.matmul %14, %15, %cst_8 {dimension_numbers = #tpu.dot_dimension_numbers<[1], [0], [0], [1], [0, 0, 1, 1], [], []>} : vector<8x20xf32>, vector<20x16xf32>, vector<8x16xf32> -> vector<8x16xf32>
    %c0_9 = arith.constant 0 : index
    %c8 = arith.constant 8 : index
    %17 = vector.load %arg5[%c0_9, %c8] : memref<8x28xf32, #tpu.memory_space<vmem>>, vector<8x16xf32>
    tpu.vector_store %arg5[%c0_9, %c8], %16 {strides = array<i32>} : memref<8x28xf32, #tpu.memory_space<vmem>>, vector<8x16xf32>,
    %c0_10 = arith.constant 0 : index
    %c2 = arith.constant 2 : index
    %18 = vector.load %arg1[%c0_10, %c2] : memref<8x3xi32, #tpu.memory_space<vmem>>, vector<8x1xi32>
    %19 = tpu.iota {dimensions = array<i32: 1>} : vector<8x7xi32>
    %20 = vector.broadcast %18 : vector<8x1xi32> to vector<8x7xi32>
    %21 = arith.cmpi eq, %20, %19 : vector<8x7xi32>
    %22 = arith.extui %21 : vector<8x7xi1> to vector<8x7xi32>
    %23 = arith.sitofp %22 : vector<8x7xi32> to vector<8x7xf32>
    %c0_11 = arith.constant 0 : index
    %c0_12 = arith.constant 0 : index
    %24 = vector.load %arg4[%c0_11, %c0_12] : memref<7x4xf32, #tpu.memory_space<vmem>>, vector<7x4xf32>
    %cst_13 = arith.constant dense<0.000000e+00> : vector<8x4xf32>
    %25 = tpu.matmul %23, %24, %cst_13 {dimension_numbers = #tpu.dot_dimension_numbers<[1], [0], [0], [1], [0, 0, 1, 1], [], []>} : vector<8x7xf32>, vector<7x4xf32>, vector<8x4xf32> -> vector<8x4xf32>
    %c0_14 = arith.constant 0 : index
    %c24 = arith.constant 24 : index
    %26 = vector.load %arg5[%c0_14, %c24] : memref<8x28xf32, #tpu.memory_space<vmem>>, vector<8x4xf32>
    tpu.vector_store %arg5[%c0_14, %c24], %25 {strides = array<i32>} : memref<8x28xf32, #tpu.memory_space<vmem>>, vector<8x4xf32>,
    return
  }
  func.func @transform_0(%arg0: i32) -> (i32, i32) {
    %c0_i32 = arith.constant 0 : i32
    %c0_i32_0 = arith.constant 0 : i32
    return %arg0, %c0_i32 : i32, i32
  }
  func.func @transform_1(%arg0: i32) -> (i32, i32) {
    %c0_i32 = arith.constant 0 : i32
    %c0_i32_0 = arith.constant 0 : i32
    %c0_i32_1 = arith.constant 0 : i32
    return %c0_i32, %c0_i32_0 : i32, i32
  }
  func.func @transform_2(%arg0: i32) -> (i32, i32) {
    %c0_i32 = arith.constant 0 : i32
    %c0_i32_0 = arith.constant 0 : i32
    %c0_i32_1 = arith.constant 0 : i32
    return %c0_i32, %c0_i32_0 : i32, i32
  }
  func.func @transform_3(%arg0: i32) -> (i32, i32) {
    %c0_i32 = arith.constant 0 : i32
    %c0_i32_0 = arith.constant 0 : i32
    %c0_i32_1 = arith.constant 0 : i32
    return %c0_i32, %c0_i32_0 : i32, i32
  }
  func.func @transform_4(%arg0: i32) -> (i32, i32) {
    %c0_i32 = arith.constant 0 : i32
    %c0_i32_0 = arith.constant 0 : i32
    return %arg0, %c0_i32 : i32, i32
  }
}

</mosaic_0001>

<bundles_post_ra>
// kernel: _concatenated_embeddings_forward.1
= control target key start
LH: loop header
LB: loop body
LE: loop exit
PB: predicated region body
PF: predicated region fallthrough
CT: control target
= control target key end

     0   :  { %v393_v2 = vmov 0   ;;  %v394_v3 = vmov 2   ;;  %vm33_vm0 = vcmask 1041408   ;;  %vm395_vm1 = vmmov 1   ;;  %s464_s0 = inlined_call_operand.vmem [shape: s32[8,3], index: 0, kind: input, shape index: {}]   ;;  %s465_s1 = inlined_call_operand.vmem [shape: f32[10,8], index: 1, kind: input, shape index: {}]   ;;  %s466_s2 = inlined_call_operand.vmem [shape: f32[20,16], index: 2, kind: input, shape index: {}]   ;;  %s467_s3 = inlined_call_operand.vmem [shape: f32[7,4], index: 3, kind: input, shape index: {}]   ;;  %s468_s4 = inlined_call_operand.hbm [shape: f32[8,28], index: 4, kind: output, shape index: {}]  }
   0x1   :  { %v18_v0 = vld [vmem:[%s464_s0] sm:$0xff]  ;;  %365 = vset.pattern.permute.xlu0 %v393_v2  ;;  %367 = vset.pattern.permute.xlu1 %v394_v3  ;;  %v28_v4 = vld [vmem:[%s465_s1 + $0x8] sm:$0x3]  ;;  %vm350_vm2 = vmpackc.low %vm33_vm0, %vm395_vm1  ;;  %v396_v8 = vmov 0.0|0.0   ;;  %vm397_vm3 = vmmov 0   ;;  %v398_v9 = vmov 0.0  }
   0x2   :  { %v27_v1 = vld [vmem:[%s465_s1] sm:$0xff]  ;;  %22 = vperm.xlu0 %365, %v18_v0   ;;  %205 = vperm.xlu1 %367, %v18_v0   ;;  %v117_v7 = vld [vmem:[%s466_s2 + $0x8] sm:$0xff] }
   0x3   :  { %v116_v5 = vld [vmem:[%s466_s2] sm:$0xff]  ;;  %v349_v6 = vpack.c.bf16 %v28_v4, %v27_v1  ;;  %348 = vmatprep.subr.bf16.mxu0 %v396_v8  ;;  %331 = vmatprep.mubr.msk.f32.mxu0 %vm397_vm3, %v398_v9 }
   0x4   :  { %v353_v10 = vpack.c.bf16 %v117_v7, %v116_v5 }
   0x5   :  { %9 = vsyncpa [#allocation3], 0  ;;  %351 = vmatpush3.bf16.msk.msra.mxu0 %vm350_vm2, %v349_v6  ;;  %352 = vmatprep.subr.bf16.mxu1 %v396_v8  ;;  %v399_v11 = vmov 1   ;;  %v118_v12 = vld [vmem:[%s466_s2 + $0x10] sm:$0xf]  ;;  %vm123_vm4 = vcmask 1043456   ;;  %v19_v13 = vlaneseq }
   0x6   :  { %354 = vmatpush3.bf16.msra.mxu1 %v353_v10  ;;  %340 = vmatprep.mubr.msk.f32.mxu1 %vm397_vm3, %v398_v9  ;;  %vm29_vm5 = vcmask 80896   ;;  %v210_v17 = vld [vmem:[%s467_s3] sm:$0x7f]  ;;  %vm215_vm8 = vcmask 1046528   ;;  %vm211_vm9 = vcmask 56320   ;;  %vm119_vm10 = vcmask 162816  }
   0x7   :  { %366 = vset.pattern.permute.xlu0 %v399_v11  ;;  %338 = vmatprep.subr.mxu1 %v398_v9  ;;  %v20_v14 = vand.u32 127, %v19_v13  ;;  %vm107_vm12 = vcmask 64512   ;;  %s400_s2 = smov 8   ;;  %s401_s3 = smov 24   ;;  %vm201_vm13 = vcmask 195648   ;;  %vm293_vm14 = vcmask 228544  }
   0x8   :  { %111 = vperm.xlu0 %366, %v18_v0   ;;  %343 = vmatprep.subr.mxu0 %v398_v9  ;;  %s402_s27 = smov [#allocation2]  }
   0x9   :  { %s301_s28 = sshll.u32 %s402_s27, 4  ;;  %s302_s28 = int_to_ptr.vmem [resolvable:$true] %s301_s28 }
   0xa   :  { %339 = vmatpush3.msk.msra.mxu1 %vm123_vm4, %v118_v12  ;;  %s369_s29 = scalar_lea.vmem %s302_s28, 128  ;;  %p374_p1 = scmp.lt.s32.totalorder %s302_s28, %s302_s28 }
   0xb   :  { %p370_p0 = scmp.ne.s32.totalorder %s302_s28, %s369_s29  ;;  %p375_p2 = scmp.lt.s32.totalorder %s369_s29, %s369_s29 }
   0xc   :  { %368 = vset.pattern.permute.xlu0 %v394_v3 }
   0xd   :  { %p376_p3 = por %p375_p2, %p374_p1 }
   0xf   :  { %p377_p4 = pnand %p376_p3, %p370_p0 }
  0x81   :  { %v23_v15 = vpop.permute.xlu0 %22  ;;  %v206_v16 = vpop.permute.xlu1 %205 }
  0x82   :  { %vm24_vm6 = vcmp.eq.s32.totalorder %v23_v15, %v20_v14  ;;  %vm207_vm7 = vcmp.eq.s32.totalorder %v206_v16, %v20_v14 }
  0x83   :  { %v309_v18 = vsel %vm24_vm6, 1.0, %v398_v9  ;;  %v315_v19 = vsel %vm207_vm7, 1.0, %v398_v9 }
  0x84   :  { %332 = vmatmul.mubr.msk.f32.vlgmr.msra.gmra.mrb[0].mxu0 %vm29_vm5, %v309_v18 }
  0x85   :  { %344 = vmatpush3.msk.msra.mxu0 %vm215_vm8, %v210_v17  ;;  %345 = vmatprep.mubr.msk.f32.mxu0 %vm397_vm3, %v398_v9 }
  0x87   :  { %v112_v20 = vpop.permute.xlu0 %111 }
  0x88   :  { %vm113_vm11 = vcmp.eq.s32.totalorder %v112_v20, %v20_v14  ;;  %346 = vmatmul.mubr.msk.f32.vlgmr.msra.gmra.mrb[2].mxu0 %vm211_vm9, %v315_v19 }
  0x89   :  { %v312_v21 = vsel %vm113_vm11, 1.0, %v398_v9 }
  0x8a   :  { %341 = vmatmul.mubr.msk.f32.vlgmr.msra.gmra.mrb[0].mxu1 %vm119_vm10, %v312_v21 }
 0x157   :  { %v103_v22 = vpop.f32.mrb[0].mxu0 }
 0x158   :  { %108 = vst.msk [vmem:[#allocation2] sm:$0xff] %vm107_vm12, %v103_v22  ;;  %v333_v23 = vpop.f32.mrb[1].mxu0 }
 0x15b   :  { %v285_v24 = vpop.f32.mrb[2].mxu0 }
 0x15c   :  { %v347_v26 = vpop.f32.mrb[3].mxu0 }
 0x15d   :  { %v193_v25 = vpop.f32.mrb[0].mxu1 }
 0x15e   :  { %198 = vrot.lane.b32.xlu1 %v193_v25, %s400_s2  ;;  %v342_v27 = vpop.f32.mrb[1].mxu1 }
 0x162   :  { %290 = vrot.lane.b32.xlu1 %v285_v24, %s401_s3 }
 0x1d0   :  { %v199_v28 = vpop.permute.xlu1 %198 }
 0x1d1   :  { %202 = vst.msk [vmem:[#allocation2] sm:$0xff] %vm201_vm13, %v199_v28 }
 0x1d4   :  { %v291_v29 = vpop.permute.xlu1 %290 }
 0x1d5   :  { %294 = vst.msk [vmem:[#allocation2] sm:$0xff] %vm293_vm14, %v291_v29 }
 0x1d6   :  { %380 = shalt.err (!%p377_p4)
}
 0x1d7   :  { %s381_s6 = scalar_lea.hbm %s468_s4, 128 }
 0x1d8   :  { %p382_p5 = scmp.ne.s32.totalorder %s468_s4, %s381_s6  ;;  %p385_p6 = scmp.lt.u32.totalorder %s381_s6, %s468_s4 }
 0x1da   :  { %p387_p7 = pnand %p385_p6, %p382_p5 }
 0x1dc   :  { %390 = shalt.err (!%p387_p7)
}
 0x1dd   :  { %304 = dma.vmem_to_hbm [thread:$0]  %s302_s28, 128, %s468_s4, [#allocation3]  }
 0x1de   :  { %391 = dma.done.wait [#allocation3], 128  }
 0x1df   :  { %392 = vsyncadd [#allocation3], 4294967168 }
 0x1e0   :  { %308 = vsyncpa [#allocation3], 1 }

</bundles_post_ra>
